<compile_context>
chip_gen: v5e
topology: v5e:2x2
jax: 0.10.0
libtpu: 0.0.40
codegen_flags: <defaults>
</compile_context>

<pallas_src>
import jax
import jax.numpy as jnp
from jax.experimental import pallas as pl
from jax.experimental.pallas import tpu as pltpu

_SUBLANE = 8
_MAX_BATCH_TILE = 1024          # upper cap on batch tile rows
_EMB_BUF_BUDGET = 8 * 1024 * 1024  # bytes for the double-buffered emb stream


def _round_up(x, m):
    return ((x + m - 1) // m) * m


def _pcbm_dist_kernel(emb_ref, cavs_ref, icpt_ref, wt_ref, b_ref,
                      out_ref, dist_ref):
    # emb/cavs/wt are bf16; accumulation is f32 on the MXU.
    # 1/norm is already folded into cavs_ref / icpt_ref by the wrapper.
    dist = jnp.dot(emb_ref[...], cavs_ref[...],
                   preferred_element_type=jnp.float32) + icpt_ref[...]
    dist_ref[...] = dist.astype(dist_ref.dtype)
    logits = jnp.dot(dist.astype(jnp.bfloat16), wt_ref[...],
                     preferred_element_type=jnp.float32) + b_ref[...]
    out_ref[...] = logits.astype(out_ref.dtype)


def _pcbm_fused_kernel(emb_ref, w_ref, b_ref, out_ref):
    # Collapsed form: logits = emb @ w_comb + b_comb.
    out_ref[...] = (jnp.dot(emb_ref[...], w_ref[...],
                            preferred_element_type=jnp.float32)
                    + b_ref[...]).astype(out_ref.dtype)


def _batch_tile(B, D):
    """Pick (tb, grid) so padding waste <= one tile's sublanes, double-buffered
    bf16 emb tiles stay under _EMB_BUF_BUDGET, and we get >= 2 grid steps
    whenever B allows it (v7x megacore sharding)."""
    budget_rows = _EMB_BUF_BUDGET // (4 * max(D, 1))   # 2 bufs * 2 B/elem
    max_tile = max(_SUBLANE,
                   min(_MAX_BATCH_TILE, (budget_rows // _SUBLANE) * _SUBLANE))
    n_steps = max(pl.cdiv(B, max_tile), 2 if B > _SUBLANE else 1)
    tb = _round_up(pl.cdiv(B, n_steps), _SUBLANE)
    return tb, (pl.cdiv(B, tb),)


def posthoc_linear_cbm_forward(emb, cavs, intercepts, norms, w_cls, b_cls,
                               return_dist=False):
    """emb: (B, D); cavs: (C, D); intercepts/norms: (C, 1);
       w_cls: (n_classes, C); b_cls: (n_classes,)"""
    B, D = emb.shape
    C = cavs.shape[0]
    n_classes = w_cls.shape[0]

    # Fold 1/norm into the concept parameters (exact, done once, outside kernel).
    inv_norm = 1.0 / norms.reshape(C, 1).astype(jnp.float32)            # (C, 1)
    cavs_scaled_t = (cavs.astype(jnp.float32) * inv_norm).T             # (D, C)
    icpt_scaled = (intercepts.reshape(C, 1).astype(jnp.float32)
                   * inv_norm).reshape(1, C)                            # (1, C)
    w_t = w_cls.astype(jnp.float32).T                                   # (C, nc)
    b_row = b_cls.reshape(1, n_classes).astype(jnp.float32)             # (1, nc)

    # bf16 for everything that feeds the MXU / streams from HBM.
    emb_bf = emb.astype(jnp.bfloat16)

    tb, grid = _batch_tile(B, D)

    def batch_spec(ncols):
        return pl.BlockSpec((tb, ncols), lambda i: (i, 0))

    def resident(shape):
        return pl.BlockSpec(shape, lambda i: (0, 0))

    compiler_params = pltpu.CompilerParams(
        dimension_semantics=("parallel",),
        vmem_limit_bytes=48 * 1024 * 1024,
    )

    if return_dist:
        out, dist = pl.pallas_call(
            _pcbm_dist_kernel,
            grid=grid,
            in_specs=[
                batch_spec(D),                    # emb (bf16), streamed
                resident((D, C)),                 # cavs/norm ^T (bf16), resident
                resident((1, C)),                 # intercepts/norm (f32)
                resident((C, n_classes)),         # W^T (bf16)
                resident((1, n_classes)),         # bias (f32)
            ],
            out_specs=[batch_spec(n_classes), batch_spec(C)],
            out_shape=[
                jax.ShapeDtypeStruct((B, n_classes), jnp.float32),
                jax.ShapeDtypeStruct((B, C), jnp.float32),
            ],
            compiler_params=compiler_params,
            cost_estimate=pl.CostEstimate(
                flops=2 * B * D * C + 2 * B * C * n_classes,
                transcendentals=0,
                bytes_accessed=(2 * B * D + 2 * D * C + 2 * C * n_classes
                                + 4 * B * n_classes + 4 * B * C),
            ),
        )(emb_bf, cavs_scaled_t.astype(jnp.bfloat16), icpt_scaled,
          w_t.astype(jnp.bfloat16), b_row)
        return out, dist

    # return_dist=False: collapse to one GEMM, never materialize dist.
    w_comb = cavs_scaled_t @ w_t                   # (D, nc), folded in f32
    b_comb = icpt_scaled @ w_t + b_row             # (1, nc)

    out = pl.pallas_call(
        _pcbm_fused_kernel,
        grid=grid,
        in_specs=[batch_spec(D),
                  resident((D, n_classes)),
                  resident((1, n_classes))],
        out_specs=batch_spec(n_classes),
        out_shape=jax.ShapeDtypeStruct((B, n_classes), jnp.float32),
        compiler_params=compiler_params,
        cost_estimate=pl.CostEstimate(
            flops=2 * B * D * n_classes,
            transcendentals=0,
            bytes_accessed=(2 * B * D + 2 * D * n_classes + 4 * B * n_classes),
        ),
    )(emb_bf, w_comb.astype(jnp.bfloat16), b_comb)
    return out


if __name__ == "__main__":
    # Small, deterministic synthetic setup consistent with the module:
    #   n_concepts = 32, embedding dim = 128, n_classes = 5, batch = 8
    key = jax.random.PRNGKey(0)
    k_emb, k_cav, k_icpt, k_norm, k_w, k_b = jax.random.split(key, 6)

    B, D, C, n_classes = 8, 128, 32, 5

    emb = jax.random.normal(k_emb, (B, D), dtype=jnp.float32)
    cavs = jax.random.normal(k_cav, (C, D), dtype=jnp.float32)
    intercepts = jax.random.normal(k_icpt, (C, 1), dtype=jnp.float32)
    # norms must be positive (they are L2 norms in the ConceptBank)
    norms = jax.random.uniform(k_norm, (C, 1), dtype=jnp.float32,
                               minval=0.5, maxval=2.0)
    # nn.Linear(n_concepts, n_classes) params
    w_cls = jax.random.normal(k_w, (n_classes, C), dtype=jnp.float32) * 0.1
    b_cls = jax.random.normal(k_b, (n_classes,), dtype=jnp.float32) * 0.1

    out, dist = posthoc_linear_cbm_forward(
        emb, cavs, intercepts, norms, w_cls, b_cls, return_dist=True)
    out_nodist = posthoc_linear_cbm_forward(
        emb, cavs, intercepts, norms, w_cls, b_cls, return_dist=False)
    jax.block_until_ready((out, dist, out_nodist))

    # Reference check against plain JAX (same math as the PyTorch module).
    # Tolerances are loosened because MXU operands are bf16 (f32 accumulation).
    margins_ref = (cavs @ emb.T + intercepts) / norms        # (C, B)
    dist_ref = margins_ref.T                                  # (B, C)
    out_ref = dist_ref @ w_cls.T + b_cls                      # (B, n_classes)
    assert dist.shape == (B, C) and out.shape == (B, n_classes)
    assert jnp.allclose(dist, dist_ref, atol=0.25, rtol=0.02)
    assert jnp.allclose(out, out_ref, atol=0.3, rtol=0.03)
    # Collapsed single-GEMM path: same math, different summation order.
    assert jnp.allclose(out_nodist, out_ref, atol=0.3, rtol=0.03)

    print("KERNEL_OK")
</pallas_src>

<mosaic_0001>
module attributes {stable_mosaic.version = 11 : i64} {
  func.func @_pcbm_dist_kernel(%arg0: i32, %arg1: memref<8x128xbf16, #tpu.memory_space<vmem>>, %arg2: memref<128x32xbf16, #tpu.memory_space<vmem>>, %arg3: memref<1x32xf32, #tpu.memory_space<vmem>>, %arg4: memref<32x5xbf16, #tpu.memory_space<vmem>>, %arg5: memref<1x5xf32, #tpu.memory_space<vmem>>, %arg6: memref<8x5xf32, #tpu.memory_space<vmem>>, %arg7: memref<8x32xf32, #tpu.memory_space<vmem>>) attributes {dimension_semantics = [#tpu.dimension_semantics<parallel>], iteration_bounds = array<i64: 1>, scalar_prefetch = 0 : i64, scratch_operands = 0 : i64, tpu.core_type = #tpu.core_type<tc>, window_params = [{transform_indices = @transform_0, window_bounds = array<i64: 8, 128>}, {pipeline_mode = #tpu.pipeline_mode<synchronous>, transform_indices = @transform_1, window_bounds = array<i64: 128, 32>}, {pipeline_mode = #tpu.pipeline_mode<synchronous>, transform_indices = @transform_2, window_bounds = array<i64: 1, 32>}, {pipeline_mode = #tpu.pipeline_mode<synchronous>, transform_indices = @transform_3, window_bounds = array<i64: 32, 5>}, {pipeline_mode = #tpu.pipeline_mode<synchronous>, transform_indices = @transform_4, window_bounds = array<i64: 1, 5>}, {transform_indices = @transform_5, window_bounds = array<i64: 8, 5>}, {transform_indices = @transform_6, window_bounds = array<i64: 8, 32>}]} {
    %c0 = arith.constant 0 : index
    %c0_0 = arith.constant 0 : index
    %0 = vector.load %arg1[%c0, %c0_0] : memref<8x128xbf16, #tpu.memory_space<vmem>>, vector<8x128xbf16>
    %c0_1 = arith.constant 0 : index
    %c0_2 = arith.constant 0 : index
    %1 = vector.load %arg2[%c0_1, %c0_2] : memref<128x32xbf16, #tpu.memory_space<vmem>>, vector<128x32xbf16>
    %cst = arith.constant dense<0.000000e+00> : vector<8x32xf32>
    %2 = tpu.matmul %0, %1, %cst {dimension_numbers = #tpu.dot_dimension_numbers<[1], [0], [0], [1], [0, 0, 1, 1], [], []>} : vector<8x128xbf16>, vector<128x32xbf16>, vector<8x32xf32> -> vector<8x32xf32>
    %c0_3 = arith.constant 0 : index
    %c0_4 = arith.constant 0 : index
    %3 = vector.load %arg3[%c0_3, %c0_4] : memref<1x32xf32, #tpu.memory_space<vmem>>, vector<1x32xf32>
    %4 = vector.broadcast %3 : vector<1x32xf32> to vector<8x32xf32>
    %5 = arith.addf %2, %4 : vector<8x32xf32>
    %c0_5 = arith.constant 0 : index
    %c0_6 = arith.constant 0 : index
    %6 = vector.load %arg7[%c0_5, %c0_6] : memref<8x32xf32, #tpu.memory_space<vmem>>, vector<8x32xf32>
    tpu.vector_store %arg7[%c0_5, %c0_6], %5 {strides = array<i32>} : memref<8x32xf32, #tpu.memory_space<vmem>>, vector<8x32xf32>,
    %7 = arith.truncf %5 : vector<8x32xf32> to vector<8x32xbf16>
    %c0_7 = arith.constant 0 : index
    %c0_8 = arith.constant 0 : index
    %8 = vector.load %arg4[%c0_7, %c0_8] : memref<32x5xbf16, #tpu.memory_space<vmem>>, vector<32x5xbf16>
    %cst_9 = arith.constant dense<0.000000e+00> : vector<8x5xf32>
    %9 = tpu.matmul %7, %8, %cst_9 {dimension_numbers = #tpu.dot_dimension_numbers<[1], [0], [0], [1], [0, 0, 1, 1], [], []>} : vector<8x32xbf16>, vector<32x5xbf16>, vector<8x5xf32> -> vector<8x5xf32>
    %c0_10 = arith.constant 0 : index
    %c0_11 = arith.constant 0 : index
    %10 = vector.load %arg5[%c0_10, %c0_11] : memref<1x5xf32, #tpu.memory_space<vmem>>, vector<1x5xf32>
    %11 = vector.broadcast %10 : vector<1x5xf32> to vector<8x5xf32>
    %12 = arith.addf %9, %11 : vector<8x5xf32>
    %c0_12 = arith.constant 0 : index
    %c0_13 = arith.constant 0 : index
    %13 = vector.load %arg6[%c0_12, %c0_13] : memref<8x5xf32, #tpu.memory_space<vmem>>, vector<8x5xf32>
    tpu.vector_store %arg6[%c0_12, %c0_13], %12 {strides = array<i32>} : memref<8x5xf32, #tpu.memory_space<vmem>>, vector<8x5xf32>,
    return
  }
  func.func @transform_0(%arg0: i32) -> (i32, i32) {
    %c0_i32 = arith.constant 0 : i32
    %c0_i32_0 = arith.constant 0 : i32
    return %arg0, %c0_i32 : i32, i32
  }
  func.func @transform_1(%arg0: i32) -> (i32, i32) {
    %c0_i32 = arith.constant 0 : i32
    %c0_i32_0 = arith.constant 0 : i32
    %c0_i32_1 = arith.constant 0 : i32
    return %c0_i32, %c0_i32_0 : i32, i32
  }
  func.func @transform_2(%arg0: i32) -> (i32, i32) {
    %c0_i32 = arith.constant 0 : i32
    %c0_i32_0 = arith.constant 0 : i32
    %c0_i32_1 = arith.constant 0 : i32
    return %c0_i32, %c0_i32_0 : i32, i32
  }
  func.func @transform_3(%arg0: i32) -> (i32, i32) {
    %c0_i32 = arith.constant 0 : i32
    %c0_i32_0 = arith.constant 0 : i32
    %c0_i32_1 = arith.constant 0 : i32
    return %c0_i32, %c0_i32_0 : i32, i32
  }
  func.func @transform_4(%arg0: i32) -> (i32, i32) {
    %c0_i32 = arith.constant 0 : i32
    %c0_i32_0 = arith.constant 0 : i32
    %c0_i32_1 = arith.constant 0 : i32
    return %c0_i32, %c0_i32_0 : i32, i32
  }
  func.func @transform_5(%arg0: i32) -> (i32, i32) {
    %c0_i32 = arith.constant 0 : i32
    %c0_i32_0 = arith.constant 0 : i32
    return %arg0, %c0_i32 : i32, i32
  }
  func.func @transform_6(%arg0: i32) -> (i32, i32) {
    %c0_i32 = arith.constant 0 : i32
    %c0_i32_0 = arith.constant 0 : i32
    return %arg0, %c0_i32 : i32, i32
  }
}

</mosaic_0001>

<bundles_post_ra>
// kernel: tpu_custom_call.1
= control target key start
LH: loop header
LB: loop body
LE: loop exit
PB: predicated region body
PF: predicated region fallthrough
CT: control target
= control target key end

     0   :  { %12 = vsyncpa [#allocation3], 0  ;;  %s369_s0 = inlined_call_operand.vmem [shape: bf16[8,128], index: 0, kind: input, shape index: {}]   ;;  %s370_s1 = inlined_call_operand.vmem [shape: bf16[128,32], index: 1, kind: input, shape index: {}]   ;;  %s371_s2 = inlined_call_operand.vmem [shape: f32[1,32], index: 2, kind: input, shape index: {}]   ;;  %s372_s3 = inlined_call_operand.vmem [shape: bf16[32,5], index: 3, kind: input, shape index: {}]   ;;  %s373_s4 = inlined_call_operand.vmem [shape: f32[1,5], index: 4, kind: input, shape index: {}]   ;;  %s374_s5 = inlined_call_operand.hbm [shape: f32[8,5], index: 5, kind: output, shape index: {0}]   ;;  %s375_s6 = inlined_call_operand.hbm [shape: f32[8,32], index: 6, kind: output, shape index: {1}]  }
   0x1   :  { %v228_v0 = vld [vmem:[%s370_s1 + $0x38] sm:$0xff]  ;;  %v227_v1 = vld [vmem:[%s370_s1 + $0x30] sm:$0xff]  ;;  %v230_v2 = vld [vmem:[%s372_s3 + $0x8] sm:$0xff] }
   0x2   :  { %94 = vmatpush.bf16.msra.mxu0 %v228_v0 }
   0x3   :  { %13 = vsyncpa [#allocation5], 0  ;;  %139 = vmatpush.bf16.msra.mxu1 %v230_v2  ;;  %v226_v3 = vld [vmem:[%s370_s1 + $0x28] sm:$0xff]  ;;  %v225_v4 = vld [vmem:[%s370_s1 + $0x20] sm:$0xff]  ;;  %vm107_vm0 = vcmask 261120   ;;  %s166_s23 = sshll.u32 %s375_s6, 4  ;;  %s167_s23 = int_to_ptr.hbm [resolvable:$true] %s166_s23 }
   0x4   :  { %v224_v5 = vld [vmem:[%s370_s1 + $0x18] sm:$0xff]  ;;  %v223_v6 = vld [vmem:[%s370_s1 + $0x10] sm:$0xff]  ;;  %v222_v7 = vld [vmem:[%s370_s1 + $0x8] sm:$0xff]  ;;  %s155_s28 = sshll.u32 %s374_s5, 4  ;;  %vm146_vm1 = vcmask 39936   ;;  %s156_s28 = int_to_ptr.hbm [resolvable:$true] %s155_s28 }
   0x5   :  { %v221_v8 = vld [vmem:[%s370_s1] sm:$0xff]  ;;  %s287_s1 = smov [#allocation4]  }
   0x6   :  { %95 = vmatpush.bf16.msra.mxu0 %v227_v1  ;;  %v25_v9 = vld [vmem:[%s369_s0] sm:$0xf]  ;;  %s164_s21 = sshll.u32 %s287_s1, 4  ;;  %s165_s21 = int_to_ptr.vmem [resolvable:$true] %s164_s21 }
   0x7   :  { %v229_v10 = vld [vmem:[%s372_s3] sm:$0xff] }
   0x8   :  { %140 = vmatpush.bf16.msra.mxu1 %v229_v10  ;;  %v233_v11 = vld [vmem:[%s371_s2] ss:$0 sm:$0xff]  ;;  %s288_s2 = smov [#allocation2]  }
   0x9   :  { %v234_v16 = vld [vmem:[%s373_s4] ss:$0 sm:$0xff]  ;;  %s153_s25 = sshll.u32 %s288_s2, 4  ;;  %s154_s25 = int_to_ptr.vmem [resolvable:$true] %s153_s25 }
   0xa   :  { %96 = vmatpush.bf16.msra.mxu0 %v226_v3 }
   0xe   :  { %97 = vmatpush.bf16.msra.mxu0 %v225_v4 }
  0x12   :  { %98 = vmatpush.bf16.msra.mxu0 %v224_v5 }
  0x16   :  { %99 = vmatpush.bf16.msra.mxu0 %v223_v6 }
  0x1a   :  { %100 = vmatpush.bf16.msra.mxu0 %v222_v7 }
  0x1e   :  { %101 = vmatpush.bf16.msra.mxu0 %v221_v8 }
  0x21   :  { %102 = vmatmul.bf16.vlgmr.msra.gmra.mxu0 %v25_v9 }
  0x9e   :  { %v103_v12 = vpop.f32.mrf.mxu0 }
  0x9f   :  { %v104_v13 = vadd.f32 %v233_v11, %v103_v12 }
  0xa1   :  { %v109_v14 = vpack.c.bf16 %v104_v13, %v104_v13  ;;  %108 = vst.msk [vmem:[#allocation4] sm:$0xff] %vm107_vm0, %v104_v13 }
  0xa2   :  { %169 = dma.vmem_to_hbm [thread:$0]  %s165_s21, 128, %s167_s23, [#allocation5]  }
  0xa3   :  { %220 = vmatmul.msk.bf16.vlgmr.msra.gmra.mxu1 %vm107_vm0, %v109_v14 }
  0xa6   :  { %v105_v15 = vpop.f32.mrf.mxu0 }
 0x120   :  { %v142_v17 = vpop.f32.mrf.mxu1 }
 0x121   :  { %v143_v18 = vadd.f32 %v234_v16, %v142_v17 }
 0x123   :  { %147 = vst.msk [vmem:[#allocation2] sm:$0xff] %vm146_vm1, %v143_v18 }
 0x124   :  { %158 = dma.vmem_to_hbm [thread:$0]  %s154_s25, 128, %s156_s28, [#allocation3]  }
 0x128   :  { %v144_v19 = vpop.f32.mrf.mxu1 }
 0x129   :  { %283 = dma.done.wait [#allocation3], 128  }
 0x12a   :  { %284 = vsyncadd [#allocation3], 4294967168 }
 0x12b   :  { %285 = dma.done.wait [#allocation5], 128  }
 0x12c   :  { %286 = vsyncadd [#allocation5], 4294967168 }
 0x12d   :  { %178 = vsyncpa [#allocation3], 1 }
 0x12e   :  { %179 = vsyncpa [#allocation5], 1 }

</bundles_post_ra>
